<compile_context>
chip_gen: v5e
topology: v5e:2x2
jax: 0.10.0
libtpu: 0.0.40
codegen_flags: <defaults>
</compile_context>

<pallas_src>
import functools
import math

import numpy as np
import jax
import jax.numpy as jnp
from jax.experimental import pallas as pl
from jax.experimental.pallas import tpu as pltpu


def _round_up(x, m):
    return ((x + m - 1) // m) * m


def _cdiv(a, b):
    return (a + b - 1) // b


def _vmem_tile_bytes(shape, dtype):
    """(sublane, 128)-padded VMEM footprint of a block (rough budget)."""
    itemsize = np.dtype(dtype).itemsize
    sublane = {4: 8, 2: 16, 1: 32}.get(itemsize, 8)
    s = [int(d) for d in shape]
    if len(s) >= 2:
        s[-2] = _round_up(s[-2], sublane)
    if len(s) >= 1:
        s[-1] = _round_up(s[-1], 128)
    n = 1
    for d in s:
        n *= d
    return n * itemsize


def _vmem_cap_bytes():
    """~80% of this chip's physical VMEM (leave headroom for the compiler)."""
    try:
        info = pltpu.get_tpu_info()
        phys = int(getattr(info, "vmem_capacity_bytes", 64 << 20))
    except Exception:
        phys = 64 << 20   # worst case (v7x) if the query is unavailable
    return int(0.80 * phys)


def _conv_fold_kernel(x_ref, w_ref, b_ref, o_ref, rhs_ref, *,
                      tap_offsets, c_in_pad, tp):
    # x_ref:   (1, 1, C_in_pad, WIN)   input window = pixel tile + halo
    # w_ref:   (C_out, K)              K = kH*kW*C_in_pad, pre-scaled weights
    # b_ref:   (C_out, 1)              pre-scaled bias
    # o_ref:   (1, C_out, TP)          lane-dense output block (TP % 128 == 0)
    # rhs_ref: (K, TP)                 VMEM scratch: stacked shifted taps
    xw = x_ref[0, 0]                                   # (C_in_pad, WIN)
    for idx, off in enumerate(tap_offsets):            # statically unrolled
        rhs_ref[idx * c_in_pad:(idx + 1) * c_in_pad, :] = xw[:, off:off + tp]
    acc = jnp.dot(w_ref[...], rhs_ref[...], preferred_element_type=jnp.float32)
    o_ref[0] = (acc + b_ref[...]).astype(o_ref.dtype)


def equalized_conv2d(x, weight, bias, stride, pad, *,
                     compute_dtype=jnp.float32, tile_pixels=2048):
    """Forward pass of EqualizedConv2d: (conv2d(x, W) + b) * sqrt(2 / fan_in).

    x:      (N, C_in, H, W)        float32  (NCHW, like torch)
    weight: (C_out, C_in, kH, kW)  float32
    bias:   (C_out,)               float32
    returns (N, C_out, H_out, W_out) float32
    """
    N, C_in, H, W = x.shape
    C_out, _, kH, kW = weight.shape
    H_out = (H + 2 * pad - kH) // stride + 1
    W_out = (W + 2 * pad - kW) // stride + 1

    fan_in = C_in * kH * kW
    scale = math.sqrt(2.0 / fan_in)

    itemsize = np.dtype(compute_dtype).itemsize
    sublane = {4: 8, 2: 16, 1: 32}.get(itemsize, 8)
    C_in_pad = _round_up(C_in, sublane)

    H_pad, W_pad = H + 2 * pad, W + 2 * pad
    # Dense (stride-1) correlation over the padded grid; stride>1 output is a
    # host-side subsample of it (no extra work for this module's stride==1).
    H_dense = H_pad - kH + 1
    P = H_dense * W_pad                               # dense rows x padded width
    TP = min(_round_up(P, 128), _round_up(tile_pixels, 128))  # lanes per step
    P_pad = _round_up(P, TP)
    num_p = P_pad // TP
    max_off = (kH - 1) * W_pad + (kW - 1)             # largest tap offset
    HALO = _round_up(max_off, 128) if max_off > 0 else 0
    WIN = TP + HALO
    L_needed = P_pad + HALO

    # --- single host-side pad: channels, spatial halo, and enough extra zero
    # rows at the bottom so the flattened length covers L_needed.
    base_len = H_pad * W_pad
    extra_rows = _cdiv(max(0, L_needed - base_len), W_pad)
    L_total = (H_pad + extra_rows) * W_pad

    x_p = jnp.pad(x, ((0, 0), (0, C_in_pad - C_in),
                      (pad, pad + extra_rows), (pad, pad)))
    x_flat = x_p.reshape(N, C_in_pad, L_total).astype(compute_dtype)
    # Per-pixel-tile windows (tile + halo); only the halo lanes are duplicated.
    x_win = jnp.stack(
        [x_flat[:, :, p * TP:p * TP + WIN] for p in range(num_p)],
        axis=1)                                       # (N, num_p, C_in_pad, WIN)

    # Fold the equalized-lr scale into weights and bias:
    # (conv(x) + b) * scale == x (*) (W*scale) + b*scale.
    K = kH * kW * C_in_pad
    w_s = weight.astype(jnp.float32) * scale
    w_s = jnp.pad(w_s, ((0, 0), (0, C_in_pad - C_in), (0, 0), (0, 0)))
    w2d = w_s.transpose(0, 2, 3, 1).reshape(C_out, K).astype(compute_dtype)
    b_col = (bias.astype(jnp.float32) * scale).reshape(C_out, 1)

    tap_offsets = tuple(kh * W_pad + kw for kh in range(kH) for kw in range(kW))

    kernel = functools.partial(_conv_fold_kernel, tap_offsets=tap_offsets,
                               c_in_pad=C_in_pad, tp=TP)

    # VMEM budget: double-buffered input window / output block / weights,
    # bias, and the K x TP RHS scratch, with headroom; generation-aware cap.
    need = (2 * (_vmem_tile_bytes((1, 1, C_in_pad, WIN), compute_dtype)
                 + _vmem_tile_bytes((1, C_out, TP), jnp.float32))
            + 2 * _vmem_tile_bytes((C_out, K), compute_dtype)
            + _vmem_tile_bytes((C_out, 1), jnp.float32)
            + _vmem_tile_bytes((K, TP), compute_dtype))
    vmem_bytes = int(min(max(2 * need + (8 << 20), 32 << 20), _vmem_cap_bytes()))

    out_flat = pl.pallas_call(
        kernel,
        out_shape=jax.ShapeDtypeStruct((N, C_out, P_pad), jnp.float32),
        grid_spec=pltpu.PrefetchScalarGridSpec(
            num_scalar_prefetch=0,
            grid=(N, num_p),
            in_specs=[
                pl.BlockSpec((1, 1, C_in_pad, WIN), lambda n, p: (n, p, 0, 0)),
                pl.BlockSpec((C_out, K), lambda n, p: (0, 0)),
                pl.BlockSpec((C_out, 1), lambda n, p: (0, 0)),
            ],
            out_specs=pl.BlockSpec((1, C_out, TP), lambda n, p: (n, 0, p)),
            scratch_shapes=[pltpu.VMEM((K, TP), compute_dtype)],
        ),
        compiler_params=pltpu.CompilerParams(
            dimension_semantics=("parallel", "parallel"),
            vmem_limit_bytes=vmem_bytes,
        ),
    )(x_win, w2d, b_col)

    # Un-flatten: crop padding garbage, subsample by stride, back to NCHW.
    out_dense = out_flat[:, :, :P].reshape(N, C_out, H_dense, W_pad)
    out = out_dense[:, :, ::stride, ::stride][:, :, :H_out, :W_out]
    return out


if __name__ == "__main__":
    # Module hyperparameters (small synthetic config).
    c_in, c_out, k_size, stride, pad = 4, 8, 3, 1, 1
    N, H, W = 2, 16, 16

    key = jax.random.PRNGKey(0)
    kx, kw_key = jax.random.split(key)

    # Deterministic "normal_()" weight init, zero bias (as in the module).
    x = jax.random.normal(kx, (N, c_in, H, W), dtype=jnp.float32)
    weight = jax.random.normal(kw_key, (c_out, c_in, k_size, k_size),
                               dtype=jnp.float32)
    bias = jnp.zeros((c_out,), dtype=jnp.float32)

    # jit the wrapper so the host glue (pad / window stack / crop) fuses.
    fwd = jax.jit(functools.partial(equalized_conv2d, stride=stride, pad=pad))
    out = jax.block_until_ready(fwd(x, weight, bias))

    # Reference check: same semantics as the torch module, (conv(x)+b)*scale.
    scale = math.sqrt(2.0 / (c_in * k_size * k_size))
    ref = jax.lax.conv_general_dilated(
        x, weight, window_strides=(stride, stride),
        padding=((pad, pad), (pad, pad)),
        dimension_numbers=("NCHW", "OIHW", "NCHW"),
    )
    ref = (ref + bias.reshape(1, -1, 1, 1)) * scale

    assert out.shape == (N, c_out, H, W)
    assert jnp.allclose(out, ref, atol=1e-4, rtol=1e-4)
    print("KERNEL_OK")
</pallas_src>

<mosaic_0001>
module attributes {stable_mosaic.version = 11 : i64} {
  func.func @_conv_fold_kernel(%arg0: i32, %arg1: i32, %arg2: memref<1x1x8x512xf32, #tpu.memory_space<vmem>>, %arg3: memref<8x72xf32, #tpu.memory_space<vmem>>, %arg4: memref<8x1xf32, #tpu.memory_space<vmem>>, %arg5: memref<1x8x384xf32, #tpu.memory_space<vmem>>, %arg6: memref<72x384xf32, #tpu.memory_space<vmem>>) attributes {dimension_semantics = [#tpu.dimension_semantics<parallel>, #tpu.dimension_semantics<parallel>], iteration_bounds = array<i64: 2, 1>, scalar_prefetch = 0 : i64, scratch_operands = 1 : i64, tpu.core_type = #tpu.core_type<tc>, window_params = [{transform_indices = @transform_0, window_bounds = array<i64: 1, 1, 8, 512>}, {pipeline_mode = #tpu.pipeline_mode<synchronous>, transform_indices = @transform_1, window_bounds = array<i64: 8, 72>}, {pipeline_mode = #tpu.pipeline_mode<synchronous>, transform_indices = @transform_2, window_bounds = array<i64: 8, 1>}, {transform_indices = @transform_3, window_bounds = array<i64: 1, 8, 384>}]} {
    %c0 = arith.constant 0 : index
    %c0_0 = arith.constant 0 : index
    %c0_1 = arith.constant 0 : index
    %c0_2 = arith.constant 0 : index
    %0 = vector.load %arg2[%c0, %c0_0, %c0_1, %c0_2] : memref<1x1x8x512xf32, #tpu.memory_space<vmem>>, vector<1x1x8x512xf32>
    %1 = vector.shape_cast %0 : vector<1x1x8x512xf32> to vector<8x512xf32>
    %2 = vector.extract_strided_slice %1 {offsets = [0, 0], sizes = [8, 384], strides = [1, 1]} : vector<8x512xf32> to vector<8x384xf32>
    %c0_3 = arith.constant 0 : index
    %c0_4 = arith.constant 0 : index
    %3 = vector.load %arg6[%c0_3, %c0_4] : memref<72x384xf32, #tpu.memory_space<vmem>>, vector<8x384xf32>
    tpu.vector_store %arg6[%c0_3, %c0_4], %2 {strides = array<i32>} : memref<72x384xf32, #tpu.memory_space<vmem>>, vector<8x384xf32>,
    %4 = vector.extract_strided_slice %1 {offsets = [0, 1], sizes = [8, 384], strides = [1, 1]} : vector<8x512xf32> to vector<8x384xf32>
    %c8 = arith.constant 8 : index
    %c0_5 = arith.constant 0 : index
    %5 = vector.load %arg6[%c8, %c0_5] : memref<72x384xf32, #tpu.memory_space<vmem>>, vector<8x384xf32>
    tpu.vector_store %arg6[%c8, %c0_5], %4 {strides = array<i32>} : memref<72x384xf32, #tpu.memory_space<vmem>>, vector<8x384xf32>,
    %6 = vector.extract_strided_slice %1 {offsets = [0, 2], sizes = [8, 384], strides = [1, 1]} : vector<8x512xf32> to vector<8x384xf32>
    %c16 = arith.constant 16 : index
    %c0_6 = arith.constant 0 : index
    %7 = vector.load %arg6[%c16, %c0_6] : memref<72x384xf32, #tpu.memory_space<vmem>>, vector<8x384xf32>
    tpu.vector_store %arg6[%c16, %c0_6], %6 {strides = array<i32>} : memref<72x384xf32, #tpu.memory_space<vmem>>, vector<8x384xf32>,
    %8 = vector.extract_strided_slice %1 {offsets = [0, 18], sizes = [8, 384], strides = [1, 1]} : vector<8x512xf32> to vector<8x384xf32>
    %c24 = arith.constant 24 : index
    %c0_7 = arith.constant 0 : index
    %9 = vector.load %arg6[%c24, %c0_7] : memref<72x384xf32, #tpu.memory_space<vmem>>, vector<8x384xf32>
    tpu.vector_store %arg6[%c24, %c0_7], %8 {strides = array<i32>} : memref<72x384xf32, #tpu.memory_space<vmem>>, vector<8x384xf32>,
    %10 = vector.extract_strided_slice %1 {offsets = [0, 19], sizes = [8, 384], strides = [1, 1]} : vector<8x512xf32> to vector<8x384xf32>
    %c32 = arith.constant 32 : index
    %c0_8 = arith.constant 0 : index
    %11 = vector.load %arg6[%c32, %c0_8] : memref<72x384xf32, #tpu.memory_space<vmem>>, vector<8x384xf32>
    tpu.vector_store %arg6[%c32, %c0_8], %10 {strides = array<i32>} : memref<72x384xf32, #tpu.memory_space<vmem>>, vector<8x384xf32>,
    %12 = vector.extract_strided_slice %1 {offsets = [0, 20], sizes = [8, 384], strides = [1, 1]} : vector<8x512xf32> to vector<8x384xf32>
    %c40 = arith.constant 40 : index
    %c0_9 = arith.constant 0 : index
    %13 = vector.load %arg6[%c40, %c0_9] : memref<72x384xf32, #tpu.memory_space<vmem>>, vector<8x384xf32>
    tpu.vector_store %arg6[%c40, %c0_9], %12 {strides = array<i32>} : memref<72x384xf32, #tpu.memory_space<vmem>>, vector<8x384xf32>,
    %14 = vector.extract_strided_slice %1 {offsets = [0, 36], sizes = [8, 384], strides = [1, 1]} : vector<8x512xf32> to vector<8x384xf32>
    %c48 = arith.constant 48 : index
    %c0_10 = arith.constant 0 : index
    %15 = vector.load %arg6[%c48, %c0_10] : memref<72x384xf32, #tpu.memory_space<vmem>>, vector<8x384xf32>
    tpu.vector_store %arg6[%c48, %c0_10], %14 {strides = array<i32>} : memref<72x384xf32, #tpu.memory_space<vmem>>, vector<8x384xf32>,
    %16 = vector.extract_strided_slice %1 {offsets = [0, 37], sizes = [8, 384], strides = [1, 1]} : vector<8x512xf32> to vector<8x384xf32>
    %c56 = arith.constant 56 : index
    %c0_11 = arith.constant 0 : index
    %17 = vector.load %arg6[%c56, %c0_11] : memref<72x384xf32, #tpu.memory_space<vmem>>, vector<8x384xf32>
    tpu.vector_store %arg6[%c56, %c0_11], %16 {strides = array<i32>} : memref<72x384xf32, #tpu.memory_space<vmem>>, vector<8x384xf32>,
    %18 = vector.extract_strided_slice %1 {offsets = [0, 38], sizes = [8, 384], strides = [1, 1]} : vector<8x512xf32> to vector<8x384xf32>
    %c64 = arith.constant 64 : index
    %c0_12 = arith.constant 0 : index
    %19 = vector.load %arg6[%c64, %c0_12] : memref<72x384xf32, #tpu.memory_space<vmem>>, vector<8x384xf32>
    tpu.vector_store %arg6[%c64, %c0_12], %18 {strides = array<i32>} : memref<72x384xf32, #tpu.memory_space<vmem>>, vector<8x384xf32>,
    %c0_13 = arith.constant 0 : index
    %c0_14 = arith.constant 0 : index
    %20 = vector.load %arg3[%c0_13, %c0_14] : memref<8x72xf32, #tpu.memory_space<vmem>>, vector<8x72xf32>
    %c0_15 = arith.constant 0 : index
    %c0_16 = arith.constant 0 : index
    %21 = vector.load %arg6[%c0_15, %c0_16] : memref<72x384xf32, #tpu.memory_space<vmem>>, vector<72x384xf32>
    %cst = arith.constant dense<0.000000e+00> : vector<8x384xf32>
    %22 = tpu.matmul %20, %21, %cst {dimension_numbers = #tpu.dot_dimension_numbers<[1], [0], [0], [1], [0, 0, 1, 1], [], []>} : vector<8x72xf32>, vector<72x384xf32>, vector<8x384xf32> -> vector<8x384xf32>
    %c0_17 = arith.constant 0 : index
    %c0_18 = arith.constant 0 : index
    %23 = vector.load %arg4[%c0_17, %c0_18] : memref<8x1xf32, #tpu.memory_space<vmem>>, vector<8x1xf32>
    %24 = vector.broadcast %23 : vector<8x1xf32> to vector<8x384xf32>
    %25 = arith.addf %22, %24 : vector<8x384xf32>
    %c0_19 = arith.constant 0 : index
    %c0_20 = arith.constant 0 : index
    %c0_21 = arith.constant 0 : index
    %26 = vector.load %arg5[%c0_19, %c0_20, %c0_21] : memref<1x8x384xf32, #tpu.memory_space<vmem>>, vector<1x8x384xf32>
    %27 = vector.shape_cast %26 : vector<1x8x384xf32> to vector<8x384xf32>
    %28 = vector.shape_cast %25 : vector<8x384xf32> to vector<1x8x384xf32>
    tpu.vector_store %arg5[%c0_19, %c0_20, %c0_21], %28 {strides = array<i32>} : memref<1x8x384xf32, #tpu.memory_space<vmem>>, vector<1x8x384xf32>,
    return
  }
  func.func @transform_0(%arg0: i32, %arg1: i32) -> (i32, i32, i32, i32) {
    %c0_i32 = arith.constant 0 : i32
    %c0_i32_0 = arith.constant 0 : i32
    %c0_i32_1 = arith.constant 0 : i32
    return %arg0, %arg1, %c0_i32, %c0_i32_0 : i32, i32, i32, i32
  }
  func.func @transform_1(%arg0: i32, %arg1: i32) -> (i32, i32) {
    %c0_i32 = arith.constant 0 : i32
    %c0_i32_0 = arith.constant 0 : i32
    %c0_i32_1 = arith.constant 0 : i32
    return %c0_i32, %c0_i32_0 : i32, i32
  }
  func.func @transform_2(%arg0: i32, %arg1: i32) -> (i32, i32) {
    %c0_i32 = arith.constant 0 : i32
    %c0_i32_0 = arith.constant 0 : i32
    %c0_i32_1 = arith.constant 0 : i32
    return %c0_i32, %c0_i32_0 : i32, i32
  }
  func.func @transform_3(%arg0: i32, %arg1: i32) -> (i32, i32, i32) {
    %c0_i32 = arith.constant 0 : i32
    %c0_i32_0 = arith.constant 0 : i32
    return %arg0, %c0_i32, %arg1 : i32, i32, i32
  }
}

</mosaic_0001>

<bundles_post_ra>
// kernel: equalized_conv2d.1
= control target key start
LH: loop header
LB: loop body
LE: loop exit
PB: predicated region body
PF: predicated region fallthrough
CT: control target
= control target key end

     0   :  { %s737_s12 = smov 0   ;;  %s739_s13 = smov 0   ;;  %s824_s0 = inlined_call_operand.vmem [shape: f32[2,1,8,512], index: 0, kind: input, shape index: {}]   ;;  %s825_s1 = inlined_call_operand.vmem [shape: f32[8,72], index: 1, kind: input, shape index: {}]   ;;  %s826_s2 = inlined_call_operand.vmem [shape: f32[8,1], index: 2, kind: input, shape index: {}]   ;;  %s827_s3 = inlined_call_operand.vmem [shape: f32[2,8,384], index: 3, kind: output, shape index: {}]  }
   0x1   :  { %s741_s14 = smov 0  }
   0x2 LB: > { %s25_s15 = sadd.s32 1, %s702_s13  ;;  %p558_p0 = scmp.ge.s32.totalorder %s706_s14, 1  ;;  %s706_s14 = sphi %s741_s14, %s13_s14   ;;  %s702_s13 = sphi %s739_s13, %s829_s13   ;;  %s698_s12 = sphi %s737_s12, %s828_s12  }
   0x3   : > { %p27_p1 = scmp.ge.s32.totalorder %s25_s15, 2  ;;  %p157_p2 = scmp.lt.s32.totalorder %s706_s14, 3 }
   0x5   : > { %s831_s15 = smov (%p27_p1, %s25_s15), 0  ;;  %p158_p3 = pnand %p558_p0, %p157_p2 }
   0x6   : > { %p189_p4 = scmp.lt.s32.totalorder (!%p158_p3), %s698_s12, 1  ;;  %s708_s20 = smov (!%p158_p3), 92  }
   0x7   : > { %161 = sbr.rel (%p158_p3) target bundleno = 309 (0x135), region = 32  ;;  %s709_s21 = smov (!%p158_p3), 90  }
   0x8   : > { %s710_s22 = smov (!%p158_p3), 108   ;;  %s711_s23 = smov (!%p158_p3), 91  }
   0x9   : > { %s712_s24 = smov (!%p158_p3), 109   ;;  %s713_s25 = smov (!%p158_p3), 110  }
   0xa   : > { %s714_s26 = smov (!%p158_p3), 126   ;;  %s715_s27 = smov (!%p158_p3), 127  }
   0xc   : > { %s833_s12 = smov (!%p189_p4, %s698_s12), 1  ;;  %vm353_vm0 = vcmask 736256   ;;  %vm335_vm1 = vcmask 744448   ;;  %vm317_vm2 = vcmask 752640   ;;  %vm299_vm3 = vcmask 883712   ;;  %v391_v33 = vld [vmem:[%s826_s2] sm:$0xff] }
   0xd   : > { %s567_s16 = sshll.u32 %s833_s12, 5  ;;  %vm281_vm4 = vcmask 891904   ;;  %vm263_vm5 = vcmask 900096   ;;  %v716_v37 = vmov 0   ;;  %vm245_vm6 = vcmask 1031168   ;;  %v363_v60 = vld [vmem:[%s825_s1] sm:$0xff] }
   0xe   : > { %s197_s19 = scalar_lea.vmem %s824_s0, %s567_s16  ;;  %682 = vset.pattern.permute.xlu1 %v716_v37  ;;  %683 = vset.pattern.permute.xlu0 %v716_v37  ;;  %vm227_vm7 = vcmask 1039360   ;;  %vm397_vm8 = vcmask 588800   ;;  %s568_s5 = smul.u32 24, %s833_s12 }
   0xf   : > { %v761_v0 = vld [vmem:[%s197_s19 + $0x10] sm:$0xff]  ;;  %v211_v1 = vld [vmem:[%s197_s19 + $0x18] sm:$0xff]  ;;  %v763_v2 = vld [vmem:[%s197_s19] sm:$0xff] }
  0x10   : > { %v612_v3 = vpack.i.bf16 %v211_v1, %v761_v0  ;;  %v766_v4 = vld [vmem:[%s197_s19 + $0x8] sm:$0xff]  ;;  %s206_s8 = scalar_lea.vmem %s827_s3, %s568_s5 }
  0x11   : > { %v622_v5 = vpack.i.bf16 %v766_v4, %v763_v2 }
  0x12   : > { %613 = vrot.lane.b32.xlu1 %v612_v3, %s708_s20  ;;  %603 = vrot.lane.b32.xlu0 %v612_v3, %s709_s21 }
  0x13   : > { %623 = vrot.lane.b32.xlu2 %v622_v5, %s709_s21 }
  0x1a   : > { %618 = vrot.lane.b32.xlu1 %v612_v3, %s710_s22  ;;  %608 = vrot.lane.b32.xlu0 %v612_v3, %s711_s23 }
  0x1b   : > { %628 = vrot.lane.b32.xlu2 %v612_v3, %s712_s24 }
  0x22   : > { %638 = vrot.lane.b32.xlu1 %v612_v3, %s713_s25  ;;  %633 = vrot.lane.b32.xlu0 %v622_v5, %s711_s23 }
  0x23   : > { %643 = vrot.lane.b32.xlu2 %v622_v5, %s708_s20 }
  0x2a   : > { %653 = vrot.lane.b32.xlu1 %v622_v5, %s710_s22  ;;  %648 = vrot.lane.b32.xlu0 %v612_v3, %s714_s26 }
  0x2b   : > { %658 = vrot.lane.b32.xlu2 %v612_v3, %s715_s27 }
  0x32   : > { %668 = vrot.lane.b32.xlu1 %v622_v5, %s713_s25  ;;  %663 = vrot.lane.b32.xlu0 %v622_v5, %s712_s24 }
  0x33   : > { %673 = vrot.lane.b32.xlu2 %v622_v5, %s714_s26 }
  0x3a   : > { %678 = vrot.lane.b32.xlu0 %v622_v5, %s715_s27  ;;  %394 = vperm.xlu1 %682, %v391_v33  }
  0x6d   : > { %v624_v6 = vpop.permute.xlu2 %623 }
  0x6e   : > { %v626_v7 = vunpack.i.h.bf16 %v624_v6  ;;  %v625_v8 = vunpack.i.l.bf16 %v624_v6 }
  0x70   : > { %v354_v9 = vsel %vm353_vm0, %v625_v8, %v626_v7 }
  0x71   : > { %408 = vmatpush.msra.mxu0 %v354_v9 }
  0x75   : > { %v770_v14 = vpop.permute.xlu2 %628 }
  0x76   : > { %v631_v25 = vunpack.i.h.bf16 %v770_v14  ;;  %v630_v26 = vunpack.i.l.bf16 %v770_v14 }
  0x78   : > { %v284_v32 = vsel %vm281_vm4, %v630_v26, %v631_v25 }
  0x7d   : > { %v644_v28 = vpop.permute.xlu2 %643 }
  0x7e   : > { %v645_v31 = vunpack.i.l.bf16 %v644_v28  ;;  %v646_v34 = vunpack.i.h.bf16 %v644_v28 }
  0x80   : > { %v318_v45 = vsel %vm317_vm2, %v645_v31, %v646_v34 }
  0x84   : > { %v614_v10 = vpop.permute.xlu1 %613  ;;  %v604_v11 = vpop.permute.xlu0 %603 }
  0x85   : > { %v606_v12 = vunpack.i.h.bf16 %v604_v11  ;;  %v605_v13 = vunpack.i.l.bf16 %v604_v11  ;;  %v616_v17 = vunpack.i.h.bf16 %v614_v10  ;;  %v615_v18 = vunpack.i.l.bf16 %v614_v10  ;;  %v659_v46 = vpop.permute.xlu2 %658 }
  0x86   : > { %v661_v48 = vunpack.i.h.bf16 %v659_v46  ;;  %v660_v49 = vunpack.i.l.bf16 %v659_v46 }
  0x87   : > { %v356_v15 = vsel %vm353_vm0, %v605_v13, %v606_v12  ;;  %v355_v16 = vsel %vm353_vm0, %v626_v7, %v605_v13  ;;  %v320_v29 = vsel %vm317_vm2, %v615_v18, %v616_v17  ;;  %v319_v47 = vsel %vm317_vm2, %v646_v34, %v615_v18 }
  0x88   : > { %448 = vmatpush.msra.mxu2 %v356_v15  ;;  %428 = vmatpush.msra.mxu1 %v355_v16  ;;  %v230_v59 = vsel %vm227_vm7, %v660_v49, %v661_v48 }
  0x8c   : > { %v619_v19 = vpop.permute.xlu1 %618  ;;  %v609_v20 = vpop.permute.xlu0 %608 }
  0x8d   : > { %v621_v21 = vunpack.i.h.bf16 %v619_v19  ;;  %v620_v22 = vunpack.i.l.bf16 %v619_v19  ;;  %v611_v23 = vunpack.i.h.bf16 %v609_v20  ;;  %v610_v24 = vunpack.i.l.bf16 %v609_v20  ;;  %v674_v61 = vpop.permute.xlu2 %673 }
  0x8e   : > { %v675_v62 = vunpack.i.l.bf16 %v674_v61  ;;  %v676_v8 = vunpack.i.h.bf16 %v674_v61 }
  0x8f   : > { %v338_v27 = vsel %vm335_vm1, %v610_v24, %v611_v23  ;;  %v302_v30 = vsel %vm299_vm3, %v620_v22, %v621_v21 }
  0x90   : > { %449 = vmatpush.msra.mxu2 %v338_v27 }
  0x92   : > { %450 = vmatpush.msra.mxu2 %v320_v29 }
  0x94   : > { %v639_v35 = vpop.permute.xlu1 %638  ;;  %451 = vmatpush.msra.mxu2 %v302_v30  ;;  %v634_v36 = vpop.permute.xlu0 %633 }
  0x95   : > { %v641_v38 = vunpack.i.h.bf16 %v639_v35  ;;  %v640_v39 = vunpack.i.l.bf16 %v639_v35  ;;  %v636_v40 = vunpack.i.h.bf16 %v634_v36  ;;  %v635_v41 = vunpack.i.l.bf16 %v634_v36 }
  0x96   : > { %452 = vmatpush.msra.mxu2 %v284_v32 }
  0x97   : > { %v336_v42 = vsel %vm335_vm1, %v635_v41, %v636_v40  ;;  %v337_v43 = vsel %vm335_vm1, %v636_v40, %v610_v24  ;;  %v266_v44 = vsel %vm263_vm5, %v640_v39, %v641_v38 }
  0x98   : > { %409 = vmatpush.msra.mxu0 %v336_v42  ;;  %429 = vmatpush.msra.mxu1 %v337_v43 }
  0x99   : > { %453 = vmatpush.msra.mxu2 %v266_v44 }
  0x9a   : > { %430 = vmatpush.msra.mxu1 %v319_v47  ;;  %410 = vmatpush.msra.mxu0 %v318_v45 }
  0x9c   : > { %v654_v50 = vpop.permute.xlu1 %653  ;;  %v649_v51 = vpop.permute.xlu0 %648 }
  0x9d   : > { %v656_v52 = vunpack.i.h.bf16 %v654_v50  ;;  %v655_v53 = vunpack.i.l.bf16 %v654_v50  ;;  %v651_v54 = vunpack.i.h.bf16 %v649_v51  ;;  %v650_v55 = vunpack.i.l.bf16 %v649_v51 }
  0x9f   : > { %v301_v56 = vsel %vm299_vm3, %v656_v52, %v620_v22  ;;  %v248_v57 = vsel %vm245_vm6, %v650_v55, %v651_v54  ;;  %v300_v58 = vsel %vm299_vm3, %v655_v53, %v656_v52  ;;  %v247_v13 = vsel %vm245_vm6, %v676_v8, %v650_v55 }
  0xa0   : > { %431 = vmatpush.msra.mxu1 %v301_v56  ;;  %454 = vmatpush.msra.mxu2 %v248_v57 }
  0xa1   : > { %411 = vmatpush.msra.mxu0 %v300_v58 }
  0xa2   : > { %455 = vmatpush.msra.mxu2 %v230_v59 }
  0xa4   : > { %v669_v63 = vpop.permute.xlu1 %668  ;;  %v664_v1 = vpop.permute.xlu0 %663  ;;  %456 = vmatpush.msra.mxu2 %v761_v0  ;;  %v246_v0 = vsel %vm245_vm6, %v675_v62, %v676_v8 }
  0xa5   : > { %v671_v3 = vunpack.i.h.bf16 %v669_v63  ;;  %v670_v5 = vunpack.i.l.bf16 %v669_v63  ;;  %v666_v6 = vunpack.i.h.bf16 %v664_v1  ;;  %v665_v7 = vunpack.i.l.bf16 %v664_v1  ;;  %564 = vmatmul.msk.f32.vlgmr.msra.gmra.mxu2 %vm397_vm8, %v363_v60 }
  0xa7   : > { %v282_v9 = vsel %vm281_vm4, %v665_v7, %v666_v6  ;;  %v283_v10 = vsel %vm281_vm4, %v666_v6, %v630_v26  ;;  %v264_v11 = vsel %vm263_vm5, %v670_v5, %v671_v3  ;;  %v265_v12 = vsel %vm263_vm5, %v671_v3, %v640_v39 }
  0xa8   : > { %412 = vmatpush.msra.mxu0 %v282_v9  ;;  %432 = vmatpush.msra.mxu1 %v283_v10 }
  0xaa   : > { %433 = vmatpush.msra.mxu1 %v265_v12  ;;  %413 = vmatpush.msra.mxu0 %v264_v11 }
  0xac   : > { %v679_v15 = vpop.permute.xlu0 %678  ;;  %434 = vmatpush.msra.mxu1 %v247_v13  ;;  %414 = vmatpush.msra.mxu0 %v246_v0  ;;  %v395_v19 = vpop.permute.xlu1 %394 }
  0xad   : > { %v681_v16 = vunpack.i.h.bf16 %v679_v15  ;;  %v680_v14 = vunpack.i.l.bf16 %v679_v15 }
  0xaf   : > { %v228_v17 = vsel %vm227_vm7, %v680_v14, %v681_v16  ;;  %v229_v18 = vsel %vm227_vm7, %v681_v16, %v660_v49 }
  0xb0   : > { %415 = vmatpush.msra.mxu0 %v228_v17  ;;  %435 = vmatpush.msra.mxu1 %v229_v18 }
  0xb2   : > { %416 = vmatpush.msra.mxu0 %v763_v2  ;;  %436 = vmatpush.msra.mxu1 %v766_v4 }
  0xb3   : > { %562 = vmatmul.msk.f32.vlgmr.msra.gmra.mxu0 %vm397_vm8, %v363_v60  ;;  %563 = vmatmul.msk.f32.vlgmr.msra.gmra.mxu1 %vm397_vm8, %v363_v60 }
 0x128   : > { %v458_v20 = vpop.f32.mrf.mxu2 }
 0x129   : > { %v459_v21 = vadd.f32 %v458_v20, %v395_v19 }
 0x12b   : > { %463 = vst [vmem:[%s206_s8 + $0x10] sm:$0xff] %v459_v21 }
 0x130   : > { %v418_v22 = vpop.f32.mrf.mxu0  ;;  %v438_v23 = vpop.f32.mrf.mxu1 }
 0x131   : > { %v419_v24 = vadd.f32 %v418_v22, %v395_v19  ;;  %v439_v25 = vadd.f32 %v438_v23, %v395_v19 }
 0x133   : > { %461 = vst [vmem:[%s206_s8] sm:$0xff] %v419_v24 }
 0x134   : > { %462 = vst [vmem:[%s206_s8 + $0x8] sm:$0xff] %v439_v25 }
 0x135 PF: > { %s13_s14 = sadd.s32 1, %s706_s14   ;;  %s828_s12 = smov %s702_s13 }
 0x136   : > { %p10_p5 = scmp.ge.s32.totalorder %s13_s14, 4   ;;  %s829_s13 = smov %s831_s15 }
 0x138   :  { %12 = sbr.rel (!%p10_p5) target bundleno = 2 (0x2), region = 62 }

</bundles_post_ra>
